<compile_context>
chip_gen: v7x
topology: tpu7x:2x2x1
jax: 0.10.0
libtpu: 0.0.40
codegen_flags: <defaults>
</compile_context>

<pallas_src>
import math

import jax
import jax.numpy as jnp
from jax.experimental import pallas as pl
from jax.experimental.pallas import tpu as pltpu


_BLOCK_BYTES = 2 * 1024 * 1024
# Sublane quantum per element size (f32 -> 8, bf16 -> 16, int8 -> 32).
# TODO(synk): packed sub-byte dtypes (int4/fp4) need a larger quantum; not
# handled here since Dummy is dtype-agnostic identity.
_SUBLANE = {4: 8, 2: 16, 1: 32}


def _identity_kernel(x_ref, o_ref):
    # Whole-tile copy through VMEM (identity forward).
    o_ref[...] = x_ref[...]


def _choose_lane_width(total_elems, sublane):
    """Widest lane-dense width (multiple of 128) dividing the flat size.

    Prefers a width that leaves at least `sublane` rows so blocks are
    sublane-dense; falls back to the widest divisor otherwise.
    """
    fallback = None
    for w in (8192, 4096, 2048, 1024, 512, 256, 128):
        if total_elems % w == 0:
            rows = total_elems // w
            if rows >= sublane:
                return w
            if fallback is None:
                fallback = w
    return fallback


def _choose_block_rows(rows, w, itemsize, sublane):
    """Pick block_rows: a sublane-multiple divisor of rows, ~_BLOCK_BYTES,
    and (when rows allow) <= rows/2 so the grid has >= 2 programs (v7x)."""
    target = max(sublane, (_BLOCK_BYTES // (w * itemsize)) // sublane * sublane)
    limit = rows // 2 if rows >= 2 * sublane else rows
    start = (min(target, limit) // sublane) * sublane
    for cand in range(start, 0, -sublane):
        if rows % cand == 0:
            return cand
    # Full extent along rows is always a legal block shape.
    return rows


def dummy_forward(x: jax.Array) -> jax.Array:
    """Forward of the Dummy module: identity, zero HBM traffic."""
    return x


def _dummy_forward_materialized(x: jax.Array) -> jax.Array:
    """Identity forward that returns a *distinct* materialized buffer via a
    Pallas copy kernel.  Only use when a separate output allocation is truly
    required; otherwise prefer `dummy_forward` (no copy)."""
    total = math.prod(x.shape) if x.ndim else 1
    itemsize = jnp.dtype(x.dtype).itemsize
    sub = _SUBLANE.get(itemsize, 8)
    w = _choose_lane_width(total, sub)
    if w is None or total == 0:
        # Shape cannot be tiled lane-dense without padding; identity semantics
        # are preserved by handing the buffer back.
        return x

    rows = total // w
    block_rows = _choose_block_rows(rows, w, itemsize, sub)
    grid = (rows // block_rows,)  # block_rows divides rows -> no masked tail

    x2d = x.reshape(rows, w)  # metadata-only under jit for dense row-major

    out2d = pl.pallas_call(
        _identity_kernel,
        out_shape=jax.ShapeDtypeStruct((rows, w), x2d.dtype),
        grid_spec=pltpu.PrefetchScalarGridSpec(
            num_scalar_prefetch=0,
            grid=grid,
            in_specs=[pl.BlockSpec((block_rows, w), lambda i: (i, 0))],
            out_specs=pl.BlockSpec((block_rows, w), lambda i: (i, 0)),
        ),
        compiler_params=pltpu.CompilerParams(
            # Row-tile axis is fully independent -> shards across both
            # TensorCores on v7x; harmless on v5e/v6e.
            dimension_semantics=("parallel",),
        ),
    )(x2d)

    return out2d.reshape(x.shape)


dummy_forward_materialized = jax.jit(_dummy_forward_materialized)


if __name__ == "__main__":
    # Dummy has no parameters — nothing to initialize.
    key = jax.random.PRNGKey(0)
    # Small audio-like input: batch=2, samples=4096 (identity forward, so the
    # exact layout has no semantic effect).
    x = jax.random.normal(key, (2, 4096), dtype=jnp.float32)

    # Default (recommended) path: zero-cost identity.
    y_fast = dummy_forward(x)
    assert y_fast.shape == x.shape and y_fast.dtype == x.dtype

    # Run the Pallas copy kernel once to prove it compiles and runs on TPU.
    y = dummy_forward_materialized(x)
    y = jax.block_until_ready(y)

    assert y.shape == x.shape and y.dtype == x.dtype
    assert bool(jnp.all(y == x))
    assert bool(jnp.all(y_fast == x))
    print("KERNEL_OK")
</pallas_src>

<mosaic_0001>
module attributes {stable_mosaic.version = 11 : i64} {
  func.func @_identity_kernel(%arg0: i32, %arg1: memref<8x1024xf32, #tpu.memory_space<vmem>>, %arg2: memref<8x1024xf32, #tpu.memory_space<vmem>>) attributes {dimension_semantics = [#tpu.dimension_semantics<parallel>], iteration_bounds = array<i64: 1>, scalar_prefetch = 0 : i64, scratch_operands = 0 : i64, tpu.core_type = #tpu.core_type<tc>, window_params = [{transform_indices = @transform_0, window_bounds = array<i64: 8, 1024>}, {transform_indices = @transform_1, window_bounds = array<i64: 8, 1024>}]} {
    %c0 = arith.constant 0 : index
    %c0_0 = arith.constant 0 : index
    %0 = vector.load %arg1[%c0, %c0_0] : memref<8x1024xf32, #tpu.memory_space<vmem>>, vector<8x1024xf32>
    %c0_1 = arith.constant 0 : index
    %c0_2 = arith.constant 0 : index
    %1 = vector.load %arg2[%c0_1, %c0_2] : memref<8x1024xf32, #tpu.memory_space<vmem>>, vector<8x1024xf32>
    tpu.vector_store %arg2[%c0_1, %c0_2], %0 {strides = array<i32>} : memref<8x1024xf32, #tpu.memory_space<vmem>>, vector<8x1024xf32>,
    return
  }
  func.func @transform_0(%arg0: i32) -> (i32, i32) {
    %c0_i32 = arith.constant 0 : i32
    %c0_i32_0 = arith.constant 0 : i32
    return %arg0, %c0_i32 : i32, i32
  }
  func.func @transform_1(%arg0: i32) -> (i32, i32) {
    %c0_i32 = arith.constant 0 : i32
    %c0_i32_0 = arith.constant 0 : i32
    return %arg0, %c0_i32 : i32, i32
  }
}

</mosaic_0001>

<bundles_post_ra>
// kernel: _dummy_forward_materialized.1
= control target key start
LH: loop header
LB: loop body
LE: loop exit
PB: predicated region body
PF: predicated region fallthrough
CT: control target
= control target key end

     0   :  { %s86_s0 = inlined_call_operand.vmem [shape: f32[8,1024], index: 0, kind: input, shape index: {}]   ;;  %s87_s1 = inlined_call_operand.vmem [shape: f32[8,1024], index: 1, kind: output, shape index: {}]  }
   0x1   :  { %v8_v0 = vld [vmem:[%s86_s0] sm:$0xff]  ;;  %v9_v1 = vld [vmem:[%s86_s0 + $0x8] sm:$0xff]  ;;  %v10_v2 = vld [vmem:[%s86_s0 + $0x10] sm:$0xff] }
   0x2   :  { %16 = vst [vmem:[%s87_s1] sm:$0xff] %v8_v0  ;;  %17 = vst [vmem:[%s87_s1 + $0x8] sm:$0xff] %v9_v1  ;;  %v11_v3 = vld [vmem:[%s86_s0 + $0x18] sm:$0xff]  ;;  %v12_v4 = vld [vmem:[%s86_s0 + $0x20] sm:$0xff] }
   0x3   :  { %18 = vst [vmem:[%s87_s1 + $0x10] sm:$0xff] %v10_v2  ;;  %v13_v5 = vld [vmem:[%s86_s0 + $0x28] sm:$0xff]  ;;  %19 = vst [vmem:[%s87_s1 + $0x18] sm:$0xff] %v11_v3  ;;  %v14_v6 = vld [vmem:[%s86_s0 + $0x30] sm:$0xff] }
   0x4   :  { %20 = vst [vmem:[%s87_s1 + $0x20] sm:$0xff] %v12_v4  ;;  %21 = vst [vmem:[%s87_s1 + $0x28] sm:$0xff] %v13_v5  ;;  %v15_v7 = vld [vmem:[%s86_s0 + $0x38] sm:$0xff] }
   0x5   :  { %22 = vst [vmem:[%s87_s1 + $0x30] sm:$0xff] %v14_v6  ;;  %23 = vst [vmem:[%s87_s1 + $0x38] sm:$0xff] %v15_v7 }

</bundles_post_ra>
